<compile_context>
chip_gen: v5e
topology: v5e:2x2
jax: 0.10.0
libtpu: 0.0.40
codegen_flags: <defaults>
</compile_context>

<pallas_src>
import jax
import jax.numpy as jnp
from jax.experimental import pallas as pl
from jax.experimental.pallas import tpu as pltpu


_INV_SQRT2 = 0.7071067811865476


def _erf_f32(x):
    # Abramowitz & Stegun 7.1.26, max abs error 1.5e-7; odd extension via where.
    p = 0.3275911
    a1, a2, a3, a4, a5 = (0.254829592, -0.284496736, 1.421413741,
                          -1.453152027, 1.061405429)
    ax = jnp.abs(x)
    t = 1.0 / (1.0 + p * ax)
    poly = ((((a5 * t + a4) * t + a3) * t + a2) * t + a1) * t
    y = 1.0 - poly * jnp.exp(-ax * ax)
    return jnp.where(x >= 0.0, y, -y)


def _gelu_exact_f32(x):
    return 0.5 * x * (1.0 + _erf_f32(x * _INV_SQRT2))


def _geglu_kernel(x_ref, wv_ref, wg_ref, bv_ref, bg_ref, o_ref):
    x = x_ref[...]                                              # (tm, dim_in)
    # value / gate projections: MXU matmuls with f32 accumulation.
    v = jnp.dot(x, wv_ref[...], preferred_element_type=jnp.float32) + bv_ref[...]
    g = jnp.dot(x, wg_ref[...], preferred_element_type=jnp.float32) + bg_ref[...]
    o_ref[...] = (v * _gelu_exact_f32(g)).astype(o_ref.dtype)   # (tm, tn)


def _round_up(x, m):
    return (x + m - 1) // m * m


def geglu(x, weight, bias):
    """GEGLU forward.

    x:      (..., dim_in)
    weight: (2*dim_out, dim_in)   -- PyTorch nn.Linear weight layout
    bias:   (2*dim_out,)
    returns (..., dim_out)
    """
    *lead, dim_in = x.shape
    two_dout, w_in = weight.shape
    assert w_in == dim_in and two_dout % 2 == 0
    dim_out = two_dout // 2

    M = 1
    for d in lead:
        M *= d
    xf = x.reshape(M, dim_in)

    # Pre-transpose & split the projection weight in the wrapper: no transposes
    # and no lane-dim chunk slicing inside the kernel.
    wt = jnp.transpose(weight).astype(x.dtype)          # (dim_in, 2*dim_out)
    wv = wt[:, :dim_out]
    wg = wt[:, dim_out:]
    bv = bias[:dim_out].reshape(1, dim_out).astype(jnp.float32)
    bg = bias[dim_out:].reshape(1, dim_out).astype(jnp.float32)

    # Row tile (sublane axis): multiple of 8; pad M up if needed.
    tm = 256 if M >= 256 else _round_up(max(M, 1), 8)
    m_pad = _round_up(M, tm)
    if m_pad != M:
        xf = jnp.pad(xf, ((0, m_pad - M), (0, 0)))

    # Output-feature tile (lane axis): multiple of 128 when possible.
    if dim_out % 256 == 0:
        tn = 256
    elif dim_out % 128 == 0:
        tn = 128
    else:
        tn = dim_out   # small/unaligned dim_out: take it whole (lane-masked)
    # TODO(synk): for dim_in >> 8K add a K-reduction grid axis with a VMEM
    # accumulator instead of loading the full contraction dim per tile.

    grid = (m_pad // tm, dim_out // tn)

    itemsize = jnp.dtype(x.dtype).itemsize
    # double-buffered x block + 2 weight blocks + 2 bias blocks + output block
    vmem_est = (2 * tm * dim_in * itemsize
                + 2 * 2 * dim_in * tn * itemsize
                + 2 * 2 * tn * 4
                + 2 * tm * tn * itemsize)
    vmem_limit = int(min(64 * 2**20, max(32 * 2**20, 2 * vmem_est)))

    out = pl.pallas_call(
        _geglu_kernel,
        out_shape=jax.ShapeDtypeStruct((m_pad, dim_out), x.dtype),
        grid_spec=pltpu.PrefetchScalarGridSpec(
            num_scalar_prefetch=0,
            grid=grid,
            in_specs=[
                pl.BlockSpec((tm, dim_in), lambda i, j: (i, 0)),
                pl.BlockSpec((dim_in, tn), lambda i, j: (0, j)),
                pl.BlockSpec((dim_in, tn), lambda i, j: (0, j)),
                pl.BlockSpec((1, tn), lambda i, j: (0, j)),
                pl.BlockSpec((1, tn), lambda i, j: (0, j)),
            ],
            out_specs=pl.BlockSpec((tm, tn), lambda i, j: (i, j)),
        ),
        compiler_params=pltpu.CompilerParams(
            dimension_semantics=("parallel", "parallel"),
            vmem_limit_bytes=vmem_limit,
        ),
    )(xf, wv, wg, bv, bg)

    if m_pad != M:
        out = out[:M]
    return out.reshape(*lead, dim_out)


def _reference(x, weight, bias):
    """Pure-JAX mirror of the PyTorch forward (for validation)."""
    y = x @ weight.T + bias
    v, g = jnp.split(y, 2, axis=-1)
    return v * jax.nn.gelu(g, approximate=False)


if __name__ == "__main__":
    key = jax.random.PRNGKey(0)
    k1, k2, k3 = jax.random.split(key, 3)

    B, N, dim_in, dim_out = 2, 8, 32, 64
    x = jax.random.normal(k1, (B, N, dim_in), jnp.float32)
    weight = 0.2 * jax.random.normal(k2, (2 * dim_out, dim_in), jnp.float32)
    bias = 0.1 * jax.random.normal(k3, (2 * dim_out,), jnp.float32)

    out = geglu(x, weight, bias)
    out = jax.block_until_ready(out)

    ref = _reference(x, weight, bias)
    assert out.shape == (B, N, dim_out)
    max_err = jnp.max(jnp.abs(out - ref))
    assert jnp.allclose(out, ref, atol=1e-4, rtol=1e-4), f"max abs err {max_err}"

    print("KERNEL_OK")
</pallas_src>

<mosaic_0001>
module attributes {stable_mosaic.version = 11 : i64} {
  func.func @_geglu_kernel(%arg0: i32, %arg1: i32, %arg2: memref<16x32xf32, #tpu.memory_space<vmem>>, %arg3: memref<32x64xf32, #tpu.memory_space<vmem>>, %arg4: memref<32x64xf32, #tpu.memory_space<vmem>>, %arg5: memref<1x64xf32, #tpu.memory_space<vmem>>, %arg6: memref<1x64xf32, #tpu.memory_space<vmem>>, %arg7: memref<16x64xf32, #tpu.memory_space<vmem>>) attributes {dimension_semantics = [#tpu.dimension_semantics<parallel>, #tpu.dimension_semantics<parallel>], iteration_bounds = array<i64: 1, 1>, scalar_prefetch = 0 : i64, scratch_operands = 0 : i64, tpu.core_type = #tpu.core_type<tc>, window_params = [{transform_indices = @transform_0, window_bounds = array<i64: 16, 32>}, {transform_indices = @transform_1, window_bounds = array<i64: 32, 64>}, {transform_indices = @transform_2, window_bounds = array<i64: 32, 64>}, {transform_indices = @transform_3, window_bounds = array<i64: 1, 64>}, {transform_indices = @transform_4, window_bounds = array<i64: 1, 64>}, {transform_indices = @transform_5, window_bounds = array<i64: 16, 64>}]} {
    %c0 = arith.constant 0 : index
    %c0_0 = arith.constant 0 : index
    %0 = vector.load %arg2[%c0, %c0_0] : memref<16x32xf32, #tpu.memory_space<vmem>>, vector<16x32xf32>
    %c0_1 = arith.constant 0 : index
    %c0_2 = arith.constant 0 : index
    %1 = vector.load %arg3[%c0_1, %c0_2] : memref<32x64xf32, #tpu.memory_space<vmem>>, vector<32x64xf32>
    %cst = arith.constant dense<0.000000e+00> : vector<16x64xf32>
    %2 = tpu.matmul %0, %1, %cst {dimension_numbers = #tpu.dot_dimension_numbers<[1], [0], [0], [1], [0, 0, 1, 1], [], []>} : vector<16x32xf32>, vector<32x64xf32>, vector<16x64xf32> -> vector<16x64xf32>
    %c0_3 = arith.constant 0 : index
    %c0_4 = arith.constant 0 : index
    %3 = vector.load %arg5[%c0_3, %c0_4] : memref<1x64xf32, #tpu.memory_space<vmem>>, vector<1x64xf32>
    %4 = vector.broadcast %3 : vector<1x64xf32> to vector<16x64xf32>
    %5 = arith.addf %2, %4 : vector<16x64xf32>
    %c0_5 = arith.constant 0 : index
    %c0_6 = arith.constant 0 : index
    %6 = vector.load %arg4[%c0_5, %c0_6] : memref<32x64xf32, #tpu.memory_space<vmem>>, vector<32x64xf32>
    %cst_7 = arith.constant dense<0.000000e+00> : vector<16x64xf32>
    %7 = tpu.matmul %0, %6, %cst_7 {dimension_numbers = #tpu.dot_dimension_numbers<[1], [0], [0], [1], [0, 0, 1, 1], [], []>} : vector<16x32xf32>, vector<32x64xf32>, vector<16x64xf32> -> vector<16x64xf32>
    %c0_8 = arith.constant 0 : index
    %c0_9 = arith.constant 0 : index
    %8 = vector.load %arg6[%c0_8, %c0_9] : memref<1x64xf32, #tpu.memory_space<vmem>>, vector<1x64xf32>
    %9 = vector.broadcast %8 : vector<1x64xf32> to vector<16x64xf32>
    %10 = arith.addf %7, %9 : vector<16x64xf32>
    %cst_10 = arith.constant 5.000000e-01 : f32
    %11 = vector.broadcast %cst_10 : f32 to vector<16x64xf32>
    %12 = arith.mulf %11, %10 : vector<16x64xf32>
    %cst_11 = arith.constant 0.707106769 : f32
    %13 = vector.broadcast %cst_11 : f32 to vector<16x64xf32>
    %14 = arith.mulf %10, %13 : vector<16x64xf32>
    %15 = math.absf %14 : vector<16x64xf32>
    %cst_12 = arith.constant 0.327591091 : f32
    %16 = vector.broadcast %cst_12 : f32 to vector<16x64xf32>
    %17 = arith.mulf %16, %15 : vector<16x64xf32>
    %cst_13 = arith.constant 1.000000e+00 : f32
    %18 = vector.broadcast %cst_13 : f32 to vector<16x64xf32>
    %19 = arith.addf %18, %17 : vector<16x64xf32>
    %cst_14 = arith.constant 1.000000e+00 : f32
    %20 = vector.broadcast %cst_14 : f32 to vector<16x64xf32>
    %21 = arith.divf %20, %19 : vector<16x64xf32>
    %cst_15 = arith.constant 1.06140542 : f32
    %22 = vector.broadcast %cst_15 : f32 to vector<16x64xf32>
    %23 = arith.mulf %22, %21 : vector<16x64xf32>
    %cst_16 = arith.constant -1.45315206 : f32
    %24 = vector.broadcast %cst_16 : f32 to vector<16x64xf32>
    %25 = arith.addf %23, %24 : vector<16x64xf32>
    %26 = arith.mulf %25, %21 : vector<16x64xf32>
    %cst_17 = arith.constant 1.42141378 : f32
    %27 = vector.broadcast %cst_17 : f32 to vector<16x64xf32>
    %28 = arith.addf %26, %27 : vector<16x64xf32>
    %29 = arith.mulf %28, %21 : vector<16x64xf32>
    %cst_18 = arith.constant -0.284496725 : f32
    %30 = vector.broadcast %cst_18 : f32 to vector<16x64xf32>
    %31 = arith.addf %29, %30 : vector<16x64xf32>
    %32 = arith.mulf %31, %21 : vector<16x64xf32>
    %cst_19 = arith.constant 0.254829586 : f32
    %33 = vector.broadcast %cst_19 : f32 to vector<16x64xf32>
    %34 = arith.addf %32, %33 : vector<16x64xf32>
    %35 = arith.mulf %34, %21 : vector<16x64xf32>
    %cst_20 = arith.constant 0.000000e+00 : f32
    %36 = vector.broadcast %cst_20 : f32 to vector<16x64xf32>
    %37 = arith.subf %36, %15 : vector<16x64xf32>
    %38 = arith.mulf %37, %15 : vector<16x64xf32>
    %39 = math.exp %38 : vector<16x64xf32>
    %40 = arith.mulf %35, %39 : vector<16x64xf32>
    %cst_21 = arith.constant 1.000000e+00 : f32
    %41 = vector.broadcast %cst_21 : f32 to vector<16x64xf32>
    %42 = arith.subf %41, %40 : vector<16x64xf32>
    %cst_22 = arith.constant 0.000000e+00 : f32
    %43 = vector.broadcast %cst_22 : f32 to vector<16x64xf32>
    %44 = arith.cmpf oge, %14, %43 : vector<16x64xf32>
    %cst_23 = arith.constant 0.000000e+00 : f32
    %45 = vector.broadcast %cst_23 : f32 to vector<16x64xf32>
    %46 = arith.subf %45, %42 : vector<16x64xf32>
    %47 = arith.select %44, %42, %46 : vector<16x64xi1>, vector<16x64xf32>
    %cst_24 = arith.constant 1.000000e+00 : f32
    %48 = vector.broadcast %cst_24 : f32 to vector<16x64xf32>
    %49 = arith.addf %48, %47 : vector<16x64xf32>
    %50 = arith.mulf %12, %49 : vector<16x64xf32>
    %51 = arith.mulf %5, %50 : vector<16x64xf32>
    %c0_25 = arith.constant 0 : index
    %c0_26 = arith.constant 0 : index
    %52 = vector.load %arg7[%c0_25, %c0_26] : memref<16x64xf32, #tpu.memory_space<vmem>>, vector<16x64xf32>
    tpu.vector_store %arg7[%c0_25, %c0_26], %51 {strides = array<i32>} : memref<16x64xf32, #tpu.memory_space<vmem>>, vector<16x64xf32>,
    return
  }
  func.func @transform_0(%arg0: i32, %arg1: i32) -> (i32, i32) {
    %c0_i32 = arith.constant 0 : i32
    %c0_i32_0 = arith.constant 0 : i32
    return %arg0, %c0_i32 : i32, i32
  }
  func.func @transform_1(%arg0: i32, %arg1: i32) -> (i32, i32) {
    %c0_i32 = arith.constant 0 : i32
    %c0_i32_0 = arith.constant 0 : i32
    return %c0_i32, %arg1 : i32, i32
  }
  func.func @transform_2(%arg0: i32, %arg1: i32) -> (i32, i32) {
    %c0_i32 = arith.constant 0 : i32
    %c0_i32_0 = arith.constant 0 : i32
    return %c0_i32, %arg1 : i32, i32
  }
  func.func @transform_3(%arg0: i32, %arg1: i32) -> (i32, i32) {
    %c0_i32 = arith.constant 0 : i32
    %c0_i32_0 = arith.constant 0 : i32
    return %c0_i32, %arg1 : i32, i32
  }
  func.func @transform_4(%arg0: i32, %arg1: i32) -> (i32, i32) {
    %c0_i32 = arith.constant 0 : i32
    %c0_i32_0 = arith.constant 0 : i32
    return %c0_i32, %arg1 : i32, i32
  }
  func.func @transform_5(%arg0: i32, %arg1: i32) -> (i32, i32) {
    %c0_i32 = arith.constant 0 : i32
    return %arg0, %arg1 : i32, i32
  }
}

</mosaic_0001>

<bundles_post_ra>
// kernel: tpu_custom_call.1
= control target key start
LH: loop header
LB: loop body
LE: loop exit
PB: predicated region body
PF: predicated region fallthrough
CT: control target
= control target key end

     0   :  { %10 = vsyncpa [#allocation3], 0  ;;  %s458_s0 = inlined_call_operand.hbm [shape: f32[16,32], index: 0, kind: input, shape index: {}]   ;;  %s459_s1 = inlined_call_operand.hbm [shape: f32[32,64], index: 1, kind: input, shape index: {}]   ;;  %s460_s2 = inlined_call_operand.hbm [shape: f32[32,64], index: 2, kind: input, shape index: {}]   ;;  %s461_s3 = inlined_call_operand.vmem [shape: f32[1,64], index: 3, kind: input, shape index: {}]   ;;  %s462_s4 = inlined_call_operand.vmem [shape: f32[1,64], index: 4, kind: input, shape index: {}]   ;;  %s463_s5 = inlined_call_operand.hbm [shape: f32[16,64], index: 5, kind: output, shape index: {}]  }
   0x1   :  { %11 = vsyncpa [#allocation6], 0 }
   0x2   :  { %12 = vsyncpa [#allocation4], 0  ;;  %s30_s20 = sshll.u32 %s459_s1, 4  ;;  %s374_s21 = smov [#allocation5]   ;;  %s31_s20 = int_to_ptr.hbm [resolvable:$true] %s30_s20 }
   0x3   :  { %s32_s22 = sshll.u32 %s374_s21, 4  ;;  %s17_s25 = sshll.u32 %s458_s0, 4  ;;  %s33_s22 = int_to_ptr.vmem [resolvable:$true] %s32_s22  ;;  %s18_s25 = int_to_ptr.hbm [resolvable:$true] %s17_s25 }
   0x4   :  { %s375_s26 = smov 128   ;;  %s376_s27 = smov 8  }
   0x5   :  { %38 = dma.hbm_to_vmem [thread:$0]  %s31_s20, 512, %s33_s22, [#allocation6], %s375_s26, %s375_s26, %s376_s27  }
   0x6   :  { %s377_s28 = smov [#allocation2]   ;;  %s43_s1 = sshll.u32 %s460_s2, 4  ;;  %s44_s1 = int_to_ptr.hbm [resolvable:$true] %s43_s1 }
   0x7   :  { %s19_s29 = sshll.u32 %s377_s28, 4  ;;  %s378_s0 = smov [#allocation7]   ;;  %s20_s29 = int_to_ptr.vmem [resolvable:$true] %s19_s29 }
   0x8   :  { %25 = dma.hbm_to_vmem [thread:$0]  %s18_s25, 256, %s20_s29, [#allocation3], %s375_s26, %s375_s26, %s376_s27  }
   0x9   :  { %s45_s7 = sshll.u32 %s378_s0, 4  ;;  %s46_s7 = int_to_ptr.vmem [resolvable:$true] %s45_s7 }
   0xa   :  { %51 = dma.hbm_to_vmem [thread:$0]  %s44_s1, 512, %s46_s7, [#allocation6], %s375_s26, %s375_s26, %s376_s27  }
   0xb   :  { %368 = dma.done.wait [#allocation3], 256  }
   0xc   :  { %369 = vsyncadd [#allocation3], 4294967040 }
   0xd   :  { %370 = dma.done.wait [#allocation6], 1024  }
   0xe   :  { %371 = vsyncadd [#allocation6], 4294966272  ;;  %v111_v0 = vld [vmem:[#allocation7 + $0x18] sm:$0xff]  ;;  %v110_v1 = vld [vmem:[#allocation7 + $0x10] sm:$0xff]  ;;  %vm78_vm0 = vcmask 261120   ;;  %vm221_vm10 = vcmask 523264  }
   0xf   :  { %128 = vmatpush.msra.mxu1 %v111_v0  ;;  %252 = vmatpush.msra.mxu3 %v111_v0  ;;  %v109_v2 = vld [vmem:[#allocation7 + $0x8] sm:$0xff]  ;;  %v73_v3 = vld [vmem:[#allocation5 + $0x18] sm:$0xff]  ;;  %v72_v4 = vld [vmem:[#allocation5 + $0x10] sm:$0xff]  ;;  %s230_s13 = sshll.u32 %s463_s5, 4  ;;  %s231_s13 = int_to_ptr.hbm [resolvable:$true] %s230_s13 }
  0x10   :  { %v108_v5 = vld [vmem:[#allocation7] sm:$0xff]  ;;  %97 = vmatpush.msra.mxu0 %v73_v3  ;;  %248 = vmatpush.msra.mxu2 %v73_v3  ;;  %v68_v6 = vld [vmem:[#allocation2] sm:$0xff]  ;;  %v69_v7 = vld [vmem:[#allocation2 + $0x8] sm:$0xff] }
  0x11   :  { %129 = vmatpush.msra.mxu1 %v110_v1  ;;  %253 = vmatpush.msra.mxu3 %v110_v1  ;;  %v71_v8 = vld [vmem:[#allocation5 + $0x8] sm:$0xff]  ;;  %v70_v9 = vld [vmem:[#allocation5] sm:$0xff]  ;;  %v262_v10 = vld [vmem:[%s462_s4] ss:$0 sm:$0xff] }
  0x12   :  { %98 = vmatpush.msra.mxu0 %v72_v4  ;;  %249 = vmatpush.msra.mxu2 %v72_v4  ;;  %v263_v4 = vld [vmem:[%s461_s3] ss:$0 sm:$0xff]  ;;  %s379_s3 = smov [#allocation8]  }
  0x13   :  { %130 = vmatpush.msra.mxu1 %v109_v2  ;;  %254 = vmatpush.msra.mxu3 %v109_v2  ;;  %s228_s10 = sshll.u32 %s379_s3, 4  ;;  %s229_s10 = int_to_ptr.vmem [resolvable:$true] %s228_s10 }
  0x14   :  { %99 = vmatpush.msra.mxu0 %v71_v8  ;;  %250 = vmatpush.msra.mxu2 %v71_v8 }
  0x15   :  { %131 = vmatpush.msra.mxu1 %v108_v5  ;;  %255 = vmatpush.msra.mxu3 %v108_v5 }
  0x16   :  { %246 = vmatmul.msk.f32.vlgmr.msra.gmra.mxu1 %vm78_vm0, %v68_v6  ;;  %247 = vmatmul.msk.f32.vlgmr.msra.gmra.mxu3 %vm78_vm0, %v69_v7 }
  0x17   :  { %100 = vmatpush.msra.mxu0 %v70_v9  ;;  %251 = vmatpush.msra.mxu2 %v70_v9 }
  0x18   :  { %244 = vmatmul.msk.f32.vlgmr.msra.gmra.mxu0 %vm78_vm0, %v68_v6  ;;  %245 = vmatmul.msk.f32.vlgmr.msra.gmra.mxu2 %vm78_vm0, %v69_v7 }
  0x93   :  { %v133_v11 = vpop.f32.mrf.mxu1 }
  0x94   :  { %v431_v12 = vadd.f32 %v262_v10, %v133_v11 }
  0x95   :  { %v102_v6 = vpop.f32.mrf.mxu0 }
  0x96   :  { %v434_v13 = vmul.f32 0.70710677, %v431_v12  ;;  %v139_v11 = vmul.f32 0.5, %v431_v12 }
  0x98   :  { %v143_v14 = vand.u32 2147483647, %v434_v13  ;;  %vm209_vm9 = vcmp.ge.f32.partialorder %v434_v13, 0.0 }
  0x99   :  { %v136_v15 = vpop.f32.mrf.mxu3 }
  0x9a   :  { %v145_v16 = vmul.f32 0.3275911, %v143_v14  ;;  %v437_v17 = vadd.f32 %v262_v10, %v136_v15  ;;  %v197_v34 = vsub.f32 0.0, %v143_v14 }
  0x9c   :  { %v147_v18 = vadd.f32 1.0, %v145_v16  ;;  %v440_v19 = vmul.f32 0.70710677, %v437_v17  ;;  %v199_v42 = vmul.f32 %v197_v34, %v143_v14  ;;  %v103_v14 = vadd.f32 %v263_v4, %v102_v6 }
  0x9d   :  { %v140_v13 = vmul.f32 0.5, %v437_v17 }
  0x9e   :  { %264 = vrcp.f32 %v147_v18  ;;  %v144_v20 = vand.u32 2147483647, %v440_v19  ;;  %v160_v26 = vand.u32 2147483648, %v147_v18  ;;  %vm154_vm1 = vweird.f32 %v147_v18 }
  0x9f   :  { %v158_v28 = vand.u32 2147483647, %v147_v18  ;;  %v201_v50 = vmul.f32 1.442695, %v199_v42  ;;  %vm210_vm11 = vcmp.ge.f32.partialorder %v440_v19, 0.0 }
  0xa0   :  { %v146_v21 = vmul.f32 0.3275911, %v144_v20  ;;  %v161_v31 = vor.u32 1.1754944e-38, %v160_v26  ;;  %v198_v47 = vsub.f32 0.0, %v144_v20 }
  0xa1   :  { %vm159_vm4 = vcmp.eq.f32.partialorder %v158_v28, 8.507059e+37 }
  0xa2   :  { %v148_v22 = vadd.f32 1.0, %v146_v21  ;;  %v200_v54 = vmul.f32 %v198_v47, %v144_v20 }
  0xa4   :  { %v265_v23 = vpop.eup %264  ;;  %266 = vrcp.f32 %v148_v22  ;;  %v175_v37 = vand.u32 2147483648, %v148_v22  ;;  %v173_v40 = vand.u32 2147483647, %v148_v22  ;;  %vm169_vm6 = vweird.f32 %v148_v22 }
  0xa5   :  { %v150_v24 = vmul.f32 %v265_v23, %v147_v18  ;;  %vm155_vm2 = vweird.f32 %v265_v23  ;;  %268 = vpow2.f32 %v201_v50  ;;  %v203_v59 = vmul.f32 1.442695, %v200_v54 }
  0xa6   :  { %vm156_vm3 = vmor %vm154_vm1, %vm155_vm2  ;;  %v176_v44 = vor.u32 1.1754944e-38, %v175_v37  ;;  %vm174_vm8 = vcmp.eq.f32.partialorder %v173_v40, 8.507059e+37 }
  0xa7   :  { %v151_v25 = vsub.f32 1.0, %v150_v24  ;;  %270 = vpow2.f32 %v203_v59 }
  0xa9   :  { %v152_v27 = vmul.f32 %v265_v23, %v151_v25 }
  0xaa   :  { %v267_v29 = vpop.eup %266 }
  0xab   :  { %v153_v30 = vadd.f32 %v265_v23, %v152_v27  ;;  %v165_v32 = vmul.f32 %v267_v29, %v148_v22  ;;  %vm170_vm5 = vweird.f32 %v267_v29  ;;  %v269_v63 = vpop.eup %268  ;;  %v105_v22 = vpop.f32.mrf.mxu2 }
  0xac   :  { %vm171_vm7 = vmor %vm169_vm6, %vm170_vm5  ;;  %v106_v25 = vadd.f32 %v263_v4, %v105_v22 }
  0xad   :  { %v157_v33 = vsel %vm156_vm3, %v265_v23, %v153_v30  ;;  %v166_v35 = vsub.f32 1.0, %v165_v32  ;;  %v271_v9 = vpop.eup %270 }
  0xae   :  { %v162_v36 = vsel %vm159_vm4, %v161_v31, %v157_v33 }
  0xaf   :  { %v179_v38 = vmul.f32 1.0614054, %v162_v36  ;;  %v167_v39 = vmul.f32 %v267_v29, %v166_v35 }
  0xb1   :  { %v181_v41 = vadd.f32 -1.4531521, %v179_v38  ;;  %v168_v43 = vadd.f32 %v267_v29, %v167_v39 }
  0xb3   :  { %v183_v45 = vmul.f32 %v181_v41, %v162_v36  ;;  %v172_v46 = vsel %vm171_vm7, %v267_v29, %v168_v43 }
  0xb4   :  { %v177_v49 = vsel %vm174_vm8, %v176_v44, %v172_v46 }
  0xb5   :  { %v185_v48 = vadd.f32 1.4214138, %v183_v45  ;;  %v180_v51 = vmul.f32 1.0614054, %v177_v49 }
  0xb7   :  { %v187_v52 = vmul.f32 %v185_v48, %v162_v36  ;;  %v182_v53 = vadd.f32 -1.4531521, %v180_v51 }
  0xb9   :  { %v189_v55 = vadd.f32 -0.28449672, %v187_v52  ;;  %v184_v56 = vmul.f32 %v182_v53, %v177_v49 }
  0xbb   :  { %v191_v57 = vmul.f32 %v189_v55, %v162_v36  ;;  %v186_v58 = vadd.f32 1.4214138, %v184_v56 }
  0xbd   :  { %v193_v60 = vadd.f32 0.2548296, %v191_v57  ;;  %v188_v61 = vmul.f32 %v186_v58, %v177_v49 }
  0xbf   :  { %v195_v62 = vmul.f32 %v193_v60, %v162_v36  ;;  %v190_v0 = vadd.f32 -0.28449672, %v188_v61 }
  0xc1   :  { %v205_v1 = vmul.f32 %v269_v63, %v195_v62  ;;  %v192_v2 = vmul.f32 %v190_v0, %v177_v49 }
  0xc3   :  { %v207_v3 = vsub.f32 1.0, %v205_v1  ;;  %v194_v5 = vadd.f32 0.2548296, %v192_v2 }
  0xc5   :  { %v211_v7 = vsub.f32 0.0, %v207_v3  ;;  %v196_v8 = vmul.f32 %v194_v5, %v177_v49 }
  0xc7   :  { %v213_v10 = vsel %vm209_vm9, %v207_v3, %v211_v7  ;;  %v206_v16 = vmul.f32 %v271_v9, %v196_v8 }
  0xc8   :  { %v215_v15 = vadd.f32 1.0, %v213_v10 }
  0xc9   :  { %v208_v20 = vsub.f32 1.0, %v206_v16 }
  0xca   :  { %v217_v18 = vmul.f32 %v215_v15, %v139_v11 }
  0xcb   :  { %v212_v23 = vsub.f32 0.0, %v208_v20 }
  0xcc   :  { %v219_v21 = vmul.f32 %v217_v18, %v103_v14 }
  0xcd   :  { %v214_v24 = vsel %vm210_vm11, %v208_v20, %v212_v23 }
  0xce   :  { %222 = vst.msk [vmem:[#allocation8] sm:$0xff] %vm221_vm10, %v219_v21  ;;  %v216_v26 = vadd.f32 1.0, %v214_v24 }
  0xd0   :  { %v218_v12 = vmul.f32 %v216_v26, %v140_v13 }
  0xd2   :  { %v220_v27 = vmul.f32 %v218_v12, %v106_v25 }
  0xd4   :  { %223 = vst.msk [vmem:[#allocation8 + $0x8] sm:$0xff] %vm221_vm10, %v220_v27 }
  0xd5   :  { %236 = dma.vmem_to_hbm [thread:$0]  %s229_s10, 256, %s231_s13, [#allocation4], %s375_s26, %s375_s26, %s376_s27  }
  0xd6   :  { %372 = dma.done.wait [#allocation4], 256  }
  0xd7   :  { %373 = vsyncadd [#allocation4], 4294967040 }
  0xd8   :  { %241 = vsyncpa [#allocation3], 1 }
  0xd9   :  { %242 = vsyncpa [#allocation6], 1 }
  0xda   :  { %243 = vsyncpa [#allocation4], 1 }

</bundles_post_ra>
